<compile_context>
chip_gen: v7x
topology: tpu7x:2x2x1
jax: 0.10.0
libtpu: 0.0.40
codegen_flags: <defaults>
</compile_context>

<pallas_src>
import functools

import jax
import jax.numpy as jnp
from jax import lax
from jax.experimental import pallas as pl
from jax.experimental.pallas import tpu as pltpu


def _round_up(a, b):
    return (a + b - 1) // b * b


# ----------------------------------------------------------------------------
# Pallas kernels: shared tiled matmul  (Co, K) @ (K, N*P) -> (Co, N*P)
# ----------------------------------------------------------------------------
def _matmul_kernel_single_k(w_ref, x_ref, o_ref):
    # Whole contraction fits one K tile: write the MXU result directly
    # (no accumulator scratch, no extra VMEM->VMEM copy).
    o_ref[...] = jnp.dot(w_ref[...], x_ref[...],
                         preferred_element_type=jnp.float32).astype(o_ref.dtype)


def _matmul_kernel_multi_k(w_ref, x_ref, o_ref, acc_ref):
    # grid = (num_p_tiles, num_k_tiles); K (reduction) is the LAST axis.
    @pl.when(pl.program_id(1) == 0)
    def _():
        acc_ref[...] = jnp.zeros_like(acc_ref)

    acc_ref[...] += jnp.dot(w_ref[...], x_ref[...],
                            preferred_element_type=jnp.float32)

    @pl.when(pl.program_id(1) == pl.num_programs(1) - 1)
    def _():
        o_ref[...] = acc_ref[...].astype(o_ref.dtype)


def _choose_k_tile(K):
    # K tile must be a multiple of 128 (lane dim of the weight block) or the
    # full K.  Full K is fine for small contractions (e.g. K = C*k*k = 36).
    for tk in (512, 256, 128):
        if K > tk and K % tk == 0:
            return tk
    return K


def _tiled_matmul(w_flat, col, *, tp=512, out_dtype=jnp.float32):
    """w_flat: (Co, K), col: (K, NP)  ->  (Co, NP) in `out_dtype`.

    Batch is already flattened into the NP (lane) axis by the caller.  MXU
    operands are cast to bf16 (XLA fuses the cast into the slab producer, so
    only bf16 bytes cross HBM), accumulation is f32.
    """
    Co, K = w_flat.shape
    K2, NP = col.shape
    assert K == K2, (K, K2)

    tp = max(128, (tp // 128) * 128)          # lane-dense tile
    tp = min(tp, _round_up(NP, 128))
    np_pad = _round_up(NP, tp)
    if np_pad != NP:                          # zero-pad lanes; sliced off below
        col = jnp.pad(col, ((0, 0), (0, np_pad - NP)))

    # Keep the K tile bounded for big, awkward contractions: zero-padding K
    # to a multiple of 128 does not change the product.
    if K % 128 != 0 and K > 2048:
        k_pad = _round_up(K, 128)
        w_flat = jnp.pad(w_flat, ((0, 0), (0, k_pad - K)))
        col = jnp.pad(col, ((0, k_pad - K), (0, 0)))
        K = k_pad
    tk = _choose_k_tile(K)
    nk = K // tk

    w_bf = w_flat.astype(jnp.bfloat16)
    col_bf = col.astype(jnp.bfloat16)

    mosaic = pltpu.CompilerParams(
        dimension_semantics=("parallel",) if nk == 1
        else ("parallel", "arbitrary"),
        vmem_limit_bytes=48 * 1024 * 1024)

    if nk == 1:
        out = pl.pallas_call(
            _matmul_kernel_single_k,
            out_shape=jax.ShapeDtypeStruct((Co, np_pad), out_dtype),
            grid=(np_pad // tp,),
            in_specs=[
                pl.BlockSpec((Co, K), lambda p: (0, 0)),    # weight (resident)
                pl.BlockSpec((K, tp), lambda p: (0, p)),    # columns
            ],
            out_specs=pl.BlockSpec((Co, tp), lambda p: (0, p)),
            compiler_params=mosaic,
        )(w_bf, col_bf)
    else:
        out = pl.pallas_call(
            _matmul_kernel_multi_k,
            out_shape=jax.ShapeDtypeStruct((Co, np_pad), out_dtype),
            grid=(np_pad // tp, nk),
            in_specs=[
                pl.BlockSpec((Co, tk), lambda p, kq: (0, kq)),   # weight
                pl.BlockSpec((tk, tp), lambda p, kq: (kq, p)),   # columns
            ],
            out_specs=pl.BlockSpec((Co, tp), lambda p, kq: (0, p)),
            scratch_shapes=[pltpu.VMEM((Co, tp), jnp.float32)],
            compiler_params=mosaic,
        )(w_bf, col_bf)
    return out[:, :NP] if np_pad != NP else out


# ----------------------------------------------------------------------------
# JAX glue: im2col and deformable (bilinear) im2col, emitted in (K, N*P) layout
# ----------------------------------------------------------------------------
def _im2col(x, k, stride, pad):
    """Standard zero-padded im2col.  Returns ((C*k*k, N*Ho*Wo), Ho, Wo)."""
    N, C, H, W = x.shape
    Ho = (H + 2 * pad - k) // stride + 1
    Wo = (W + 2 * pad - k) // stride + 1
    xp = jnp.pad(x, ((0, 0), (0, 0), (pad, pad), (pad, pad)))
    taps = []
    for i in range(k):
        for j in range(k):
            taps.append(xp[:, :,
                           i:i + (Ho - 1) * stride + 1:stride,
                           j:j + (Wo - 1) * stride + 1:stride])
    patches = jnp.stack(taps, axis=2)               # (N, C, k*k, Ho, Wo)
    patches = jnp.moveaxis(patches, 0, 2)           # (C, k*k, N, Ho, Wo)
    return patches.reshape(C * k * k, N * Ho * Wo), Ho, Wo


def _deform_im2col(x, offset, k, stride, pad, groups, Ho, Wo):
    """Bilinear-sampled columns for deform-conv v1.

    Gather + 4-corner combine are done here (XLA fuses them); only the final
    (C*k*k, N*Ho*Wo) column slab is materialized for the Pallas matmul.
    """
    N, C, H, W = x.shape
    Cg = C // groups
    kk = k * k
    P = Ho * Wo

    # offset channels: deform group g, tap t=(i*k+j): [2t]=dy, [2t+1]=dx
    off = offset.reshape(N, groups, kk, 2, Ho, Wo)
    off_y = off[:, :, :, 0]                          # (N, G, kk, Ho, Wo)
    off_x = off[:, :, :, 1]

    i_idx = jnp.repeat(jnp.arange(k), k).astype(jnp.float32)   # (kk,)
    j_idx = jnp.tile(jnp.arange(k), k).astype(jnp.float32)
    base_h = (i_idx[:, None, None]
              + (jnp.arange(Ho) * stride - pad)[None, :, None])  # (kk, Ho, 1)
    base_w = (j_idx[:, None, None]
              + (jnp.arange(Wo) * stride - pad)[None, None, :])  # (kk, 1, Wo)

    h_im = base_h[None, None] + off_y                # (N, G, kk, Ho, Wo)
    w_im = base_w[None, None] + off_x
    h0 = jnp.floor(h_im)
    w0 = jnp.floor(w_im)
    lh = h_im - h0
    lw = w_im - w0
    h0i = h0.astype(jnp.int32)
    w0i = w0.astype(jnp.int32)
    h1i = h0i + 1
    w1i = w0i + 1

    x_g = x.reshape(N, groups, Cg, H * W)
    col = jnp.zeros((N, groups, Cg, kk, P), jnp.float32)
    corner_defs = (
        (h0i, w0i, (1.0 - lh) * (1.0 - lw)),
        (h0i, w1i, (1.0 - lh) * lw),
        (h1i, w0i, lh * (1.0 - lw)),
        (h1i, w1i, lh * lw),
    )
    for hc, wc, wt in corner_defs:
        valid = (hc >= 0) & (hc < H) & (wc >= 0) & (wc < W)
        hcl = jnp.clip(hc, 0, H - 1)
        wcl = jnp.clip(wc, 0, W - 1)
        flat = (hcl * W + wcl).reshape(N, groups, 1, kk * P)
        v = jnp.take_along_axis(x_g, flat, axis=3)   # (N, G, Cg, kk*P)
        v = v.reshape(N, groups, Cg, kk, P)
        cf = jnp.where(valid, wt, 0.0).reshape(N, groups, 1, kk, P)
        col = col + v * cf                           # zero padding via mask

    # (N, G, Cg, kk, P) -> (C*kk, N*P): row = (g*Cg + c)*kk + t  (matches
    # w.reshape(Co, C*k*k)), lanes = batch-major flattened spatial.
    col = col.reshape(N, C, kk, P)
    col = jnp.moveaxis(col, 0, 2)                    # (C, kk, N, P)
    return col.reshape(C * kk, N * P)


# ----------------------------------------------------------------------------
# Full forward
# ----------------------------------------------------------------------------
def deform_conv_forward(x, w_offset, w_deform, k, stride, pad, groups, *,
                        tp=512, out_dtype=jnp.float32):
    """Deform_Conv.forward.  x: (N, C_in, H, W) f32 NCHW."""
    N, C, H, W = x.shape
    C_out = w_deform.shape[0]
    off_ch = w_offset.shape[0]                       # groups * 2 * k * k
    CK = C * k * k

    # --- offset = self.conv(x): im2col + Pallas tiled matmul ---
    patches, Ho, Wo = _im2col(x, k, stride, pad)                     # (CK, N*P)
    offset_flat = _tiled_matmul(w_offset.reshape(off_ch, CK), patches, tp=tp)
    offset = jnp.moveaxis(offset_flat.reshape(off_ch, N, Ho, Wo), 1, 0)

    # --- output = self.conv_offset2d(x, offset) ---
    col = _deform_im2col(x, offset, k, stride, pad, groups, Ho, Wo)  # (CK, N*P)
    out_flat = _tiled_matmul(w_deform.reshape(C_out, CK), col, tp=tp,
                             out_dtype=out_dtype)                    # (Co, N*P)
    return jnp.moveaxis(out_flat.reshape(C_out, N, Ho, Wo), 1, 0)


# ----------------------------------------------------------------------------
# Pure-JAX reference (same bf16 MXU operand precision as the kernels)
# ----------------------------------------------------------------------------
def _reference_forward(x, w_offset, w_deform, k, stride, pad, groups):
    N, C, H, W = x.shape
    C_out = w_deform.shape[0]
    CK = C * k * k

    def mm(w, col):
        return jnp.dot(w.astype(jnp.bfloat16), col.astype(jnp.bfloat16),
                       preferred_element_type=jnp.float32)

    # Offset conv via XLA's conv (independent of the im2col glue).
    offset = lax.conv_general_dilated(
        x.astype(jnp.bfloat16), w_offset.astype(jnp.bfloat16),
        window_strides=(stride, stride),
        padding=[(pad, pad), (pad, pad)],
        dimension_numbers=("NCHW", "OIHW", "NCHW"),
        preferred_element_type=jnp.float32)
    Ho, Wo = offset.shape[2], offset.shape[3]

    col = _deform_im2col(x, offset, k, stride, pad, groups, Ho, Wo)
    out = mm(w_deform.reshape(C_out, CK), col)
    return jnp.moveaxis(out.reshape(C_out, N, Ho, Wo), 1, 0)


# ----------------------------------------------------------------------------
if __name__ == "__main__":
    key = jax.random.PRNGKey(0)
    k_x, k_woff, k_wdef = jax.random.split(key, 3)

    # Small shapes consistent with the module.
    N, C_in, H, W = 2, 4, 16, 16
    C_out, ksz, stride, pad, groups = 8, 3, 1, 1, 1

    x = jax.random.normal(k_x, (N, C_in, H, W), jnp.float32)
    w_offset = 0.05 * jax.random.normal(
        k_woff, (groups * 2 * ksz * ksz, C_in, ksz, ksz), jnp.float32)
    w_deform = 0.1 * jax.random.normal(
        k_wdef, (C_out, C_in, ksz, ksz), jnp.float32)

    # tp=256 keeps the lane tile a multiple of 128 while giving the pipeline
    # more than one grid step at this small test size (N*Ho*Wo = 512).
    fwd = jax.jit(functools.partial(
        deform_conv_forward, k=ksz, stride=stride, pad=pad, groups=groups,
        tp=256))

    out = jax.block_until_ready(fwd(x, w_offset, w_deform))
    ref = _reference_forward(x, w_offset, w_deform, ksz, stride, pad, groups)

    assert out.shape == (N, C_out, 16, 16), out.shape
    err = float(jnp.max(jnp.abs(out - ref)))
    assert jnp.allclose(out, ref, atol=1e-2, rtol=1e-2), err

    print("KERNEL_OK")
</pallas_src>

<mosaic_0001>
module attributes {stable_mosaic.version = 11 : i64} {
  func.func @_matmul_kernel_single_k(%arg0: i32, %arg1: memref<18x36xbf16, #tpu.memory_space<vmem>>, %arg2: memref<36x256xbf16, #tpu.memory_space<vmem>>, %arg3: memref<18x256xf32, #tpu.memory_space<vmem>>) attributes {dimension_semantics = [#tpu.dimension_semantics<parallel>], iteration_bounds = array<i64: 2>, scalar_prefetch = 0 : i64, scratch_operands = 0 : i64, tpu.core_type = #tpu.core_type<tc>, window_params = [{pipeline_mode = #tpu.pipeline_mode<synchronous>, transform_indices = @transform_0, window_bounds = array<i64: 18, 36>}, {transform_indices = @transform_1, window_bounds = array<i64: 36, 256>}, {transform_indices = @transform_2, window_bounds = array<i64: 18, 256>}]} {
    %c0 = arith.constant 0 : index
    %c0_0 = arith.constant 0 : index
    %0 = vector.load %arg1[%c0, %c0_0] : memref<18x36xbf16, #tpu.memory_space<vmem>>, vector<18x36xbf16>
    %c0_1 = arith.constant 0 : index
    %c0_2 = arith.constant 0 : index
    %1 = vector.load %arg2[%c0_1, %c0_2] : memref<36x256xbf16, #tpu.memory_space<vmem>>, vector<36x256xbf16>
    %cst = arith.constant dense<0.000000e+00> : vector<18x256xf32>
    %2 = tpu.matmul %0, %1, %cst {dimension_numbers = #tpu.dot_dimension_numbers<[1], [0], [0], [1], [0, 0, 1, 1], [], []>} : vector<18x36xbf16>, vector<36x256xbf16>, vector<18x256xf32> -> vector<18x256xf32>
    %c0_3 = arith.constant 0 : index
    %c0_4 = arith.constant 0 : index
    %3 = vector.load %arg3[%c0_3, %c0_4] : memref<18x256xf32, #tpu.memory_space<vmem>>, vector<18x256xf32>
    tpu.vector_store %arg3[%c0_3, %c0_4], %2 {strides = array<i32>} : memref<18x256xf32, #tpu.memory_space<vmem>>, vector<18x256xf32>,
    return
  }
  func.func @transform_0(%arg0: i32) -> (i32, i32) {
    %c0_i32 = arith.constant 0 : i32
    %c0_i32_0 = arith.constant 0 : i32
    %c0_i32_1 = arith.constant 0 : i32
    return %c0_i32, %c0_i32_0 : i32, i32
  }
  func.func @transform_1(%arg0: i32) -> (i32, i32) {
    %c0_i32 = arith.constant 0 : i32
    %c0_i32_0 = arith.constant 0 : i32
    return %c0_i32, %arg0 : i32, i32
  }
  func.func @transform_2(%arg0: i32) -> (i32, i32) {
    %c0_i32 = arith.constant 0 : i32
    %c0_i32_0 = arith.constant 0 : i32
    return %c0_i32, %arg0 : i32, i32
  }
}

module attributes {stable_mosaic.version = 11 : i64} {
  func.func @_matmul_kernel_single_k(%arg0: i32, %arg1: memref<8x36xbf16, #tpu.memory_space<vmem>>, %arg2: memref<36x256xbf16, #tpu.memory_space<vmem>>, %arg3: memref<8x256xf32, #tpu.memory_space<vmem>>) attributes {dimension_semantics = [#tpu.dimension_semantics<parallel>], iteration_bounds = array<i64: 2>, scalar_prefetch = 0 : i64, scratch_operands = 0 : i64, tpu.core_type = #tpu.core_type<tc>, window_params = [{pipeline_mode = #tpu.pipeline_mode<synchronous>, transform_indices = @transform_0, window_bounds = array<i64: 8, 36>}, {transform_indices = @transform_1, window_bounds = array<i64: 36, 256>}, {transform_indices = @transform_2, window_bounds = array<i64: 8, 256>}]} {
    %c0 = arith.constant 0 : index
    %c0_0 = arith.constant 0 : index
    %0 = vector.load %arg1[%c0, %c0_0] : memref<8x36xbf16, #tpu.memory_space<vmem>>, vector<8x36xbf16>
    %c0_1 = arith.constant 0 : index
    %c0_2 = arith.constant 0 : index
    %1 = vector.load %arg2[%c0_1, %c0_2] : memref<36x256xbf16, #tpu.memory_space<vmem>>, vector<36x256xbf16>
    %cst = arith.constant dense<0.000000e+00> : vector<8x256xf32>
    %2 = tpu.matmul %0, %1, %cst {dimension_numbers = #tpu.dot_dimension_numbers<[1], [0], [0], [1], [0, 0, 1, 1], [], []>} : vector<8x36xbf16>, vector<36x256xbf16>, vector<8x256xf32> -> vector<8x256xf32>
    %c0_3 = arith.constant 0 : index
    %c0_4 = arith.constant 0 : index
    %3 = vector.load %arg3[%c0_3, %c0_4] : memref<8x256xf32, #tpu.memory_space<vmem>>, vector<8x256xf32>
    tpu.vector_store %arg3[%c0_3, %c0_4], %2 {strides = array<i32>} : memref<8x256xf32, #tpu.memory_space<vmem>>, vector<8x256xf32>,
    return
  }
  func.func @transform_0(%arg0: i32) -> (i32, i32) {
    %c0_i32 = arith.constant 0 : i32
    %c0_i32_0 = arith.constant 0 : i32
    %c0_i32_1 = arith.constant 0 : i32
    return %c0_i32, %c0_i32_0 : i32, i32
  }
  func.func @transform_1(%arg0: i32) -> (i32, i32) {
    %c0_i32 = arith.constant 0 : i32
    %c0_i32_0 = arith.constant 0 : i32
    return %c0_i32, %arg0 : i32, i32
  }
  func.func @transform_2(%arg0: i32) -> (i32, i32) {
    %c0_i32 = arith.constant 0 : i32
    %c0_i32_0 = arith.constant 0 : i32
    return %c0_i32, %arg0 : i32, i32
  }
}

</mosaic_0001>

<bundles_post_ra>
// kernel: deform_conv_forward.2
= control target key start
LH: loop header
LB: loop body
LE: loop exit
PB: predicated region body
PF: predicated region fallthrough
CT: control target
= control target key end

     0   :  { %s505_s9 = smov 0   ;;  %s507_s10 = smov 0   ;;  %s575_s0 = inlined_call_operand.vmem [shape: bf16[18,36], index: 0, kind: input, shape index: {}]   ;;  %s576_s1 = inlined_call_operand.vmem [shape: bf16[36,512], index: 1, kind: input, shape index: {}]   ;;  %s577_s2 = inlined_call_operand.vmem [shape: f32[18,512], index: 2, kind: output, shape index: {}]  }
   0x1   :  { %s509_s11 = smov 0  }
   0x2 LB: > { %s397_s12 = sadd.s32 4294967295, %s487_s11   ;;  %s522_s13 = sadd.s32 1, %s487_s11   ;;  %s487_s11 = sphi %s509_s11, %s581_s11   ;;  %s483_s10 = sphi %s507_s10, %s580_s10   ;;  %s479_s9 = sphi %s505_s9, %s579_s9  }
   0x3   : > { %s37_s14 = ssub.s32 %s487_s11, %s522_s13  ;;  %s40_s15 = sadd.s32 1, %s483_s10 }
   0x4   : > { %p38_p0 = scmp.eq.s32.totalorder %s37_s14, 0  ;;  %p47_p1 = scmp.ne.s32.totalorder %s483_s10, %s479_s9 }
   0x5   : > { %p48_p2 = scmp.eq.s32.totalorder %s487_s11, 0  ;;  %p77_p3 = scmp.eq.s32.totalorder %s397_s12, 1 }
   0x6   : > { %s533_s16 = scalar_select %p38_p0, %s483_s10, %s40_s15  }
   0x7   : > { %p49_p4 = por %p48_p2, %p47_p1  ;;  %p535_p5 = por %p77_p3, %p47_p1 }
   0x8   : > { %p400_p6 = scmp.ge.s32.totalorder %s487_s11, 2 }
   0xa   : > { %102 = sbr.rel (%p400_p6) target bundleno = 24 (0x18), region = 20 }
  0x11   : > { %105 = sbr.rel (!%p49_p4) target bundleno = 24 (0x18), region = 24  ;;  %s107_s18 = sand.u32 (%p49_p4), 1, %s483_s10  }
  0x12   : > { %s419_s19 = sshll.u32 (%p49_p4), %s487_s11, 3  ;;  %s427_s20 = smul.u32 (%p49_p4), 40, %s107_s18 }
  0x13   : > { %s112_s23 = scalar_lea.vmem (%p49_p4), %s576_s1, %s419_s19 }
  0x14   : > { %v148_v0 = vld [vmem:[%s112_s23] sm:$0xff] (%p49_p4)  ;;  %v150_v1 = vld [vmem:[%s112_s23 + $0x10] sm:$0xff] (%p49_p4)  ;;  %s109_s24 = scalar_lea.vmem (%p49_p4), [#allocation2], %s427_s20 }
  0x15   : > { %v152_v2 = vld [vmem:[%s112_s23 + $0x20] sm:$0xff] (%p49_p4)  ;;  %v154_v3 = vld [vmem:[%s112_s23 + $0x30] sm:$0xff] (%p49_p4)  ;;  %149 = vst [vmem:[%s109_s24] sm:$0xff] (%p49_p4), %v148_v0  ;;  %151 = vst [vmem:[%s109_s24 + $0x8] sm:$0xff] (%p49_p4), %v150_v1 }
  0x16   : > { %v156_v4 = vld [vmem:[%s112_s23 + $0x40] sm:$0xff] (%p49_p4)  ;;  %153 = vst [vmem:[%s109_s24 + $0x10] sm:$0xff] (%p49_p4), %v152_v2  ;;  %155 = vst [vmem:[%s109_s24 + $0x18] sm:$0xff] (%p49_p4), %v154_v3 }
  0x17   : > { %157 = vst [vmem:[%s109_s24 + $0x20] sm:$0xff] (%p49_p4), %v156_v4 }
  0x18 PF: > { %p403_p7 = scmp.ge.s32.totalorder %s487_s11, 1  ;;  %p162_p8 = scmp.lt.s32.totalorder %s487_s11, 3 }
  0x1a   : > { %p163_p9 = pnand %p403_p7, %p162_p8 }
  0x1b   : > { %s169_s25 = sand.u32 (!%p163_p9), 1, %s479_s9   ;;  %v489_v5 = vmov (!%p163_p9), 0   ;;  %vm240_vm0 = vcmask (!%p163_p9), 1041408   ;;  %v463_v14 = vld [vmem:[%s575_s0] sm:$0xff] (!%p163_p9)   ;;  %vm233_vm1 = vcmask (!%p163_p9), 293888  }
  0x1c   : > { %166 = sbr.rel (%p163_p9) target bundleno = 269 (0x10d), region = 62  ;;  %279 = vmatprep.mubr.bf16.mxu0 (!%p163_p9), %v489_v5  ;;  %289 = vmatprep.mubr.bf16.mxu1 (!%p163_p9), %v489_v5  ;;  %v464_v15 = vld [vmem:[%s575_s0 + $0x8] ss:$0 sps:$4 sm:$0x11] (!%p163_p9)  }
  0x1d   : > { %s428_s26 = smul.u32 (!%p163_p9), 40, %s169_s25 }
  0x1e   : > { %s429_s4 = smul.u32 (!%p163_p9), 48, %s169_s25 }
  0x1f   : > { %s171_s27 = scalar_lea.vmem (!%p163_p9), [#allocation2], %s428_s26 }
  0x20   : > { %v455_v6 = vld [vmem:[%s171_s27 + $0x4] ss:$8 sps:$4 sm:$0xff] (!%p163_p9)   ;;  %v457_v7 = vld [vmem:[%s171_s27] ss:$8 sps:$4 sm:$0xff] (!%p163_p9)   ;;  %v458_v8 = vld [vmem:[%s171_s27 + $0x14] ss:$8 sps:$4 sm:$0xff] (!%p163_p9)  }
  0x21   : > { %247 = vmatprep.subr.bf16.mxu0 (!%p163_p9), %v455_v6  ;;  %421 = vmatprep.subr.bf16.mxu1 (!%p163_p9), %v455_v6  ;;  %v199_v9 = vld [vmem:[%s171_s27 + $0x20] sm:$0x33] (!%p163_p9)  ;;  %v460_v10 = vld [vmem:[%s171_s27 + $0x10] ss:$8 sps:$4 sm:$0xff] (!%p163_p9)   ;;  %s188_s5 = scalar_lea.vmem (!%p163_p9), [#allocation3], %s429_s4 }
  0x22   : > { %248 = vmatpush1.bf16.msra.mxu0 (!%p163_p9), %v457_v7  ;;  %424 = vmatpush1.bf16.msra.mxu1 (!%p163_p9), %v457_v7  ;;  %v411_v11 = vcombine.high (!%p163_p9), %v199_v9, %v199_v9  ;;  %v410_v12 = vcombine.low (!%p163_p9), %v199_v9, %v199_v9 }
  0x23   : > { %249 = vmatprep.subr.bf16.mxu0 %v458_v8  ;;  %422 = vmatprep.subr.bf16.mxu1 %v458_v8  ;;  %s420_s6 = sshll.u32 (%p535_p5), %s397_s12, 4 }
  0x24   : > { %v242_v13 = vsel %vm240_vm0, %v410_v12, 0  ;;  %s313_s9 = scalar_lea.vmem (%p535_p5), %s577_s2, %s420_s6 }
  0x26   : > { %250 = vmatpush1.bf16.msra.mxu0 %v460_v10  ;;  %425 = vmatpush1.bf16.msra.mxu1 %v460_v10 }
  0x27   : > { %412 = vmatprep.subr.msk.bf16.mxu0 %vm240_vm0, %v411_v11  ;;  %423 = vmatprep.subr.msk.bf16.mxu1 %vm240_vm0, %v411_v11 }
  0x2a   : > { %252 = vmatpush1.bf16.msra.mxu0 %v242_v13  ;;  %426 = vmatpush1.bf16.msra.mxu1 %v242_v13 }
  0x2d   : > { %413 = vmatmul.mubr.msk.bf16.vlgmr.msra.gmra.mrb[0].mxu0 %vm233_vm1, %v463_v14  ;;  %414 = vmatmul.mubr.msk.bf16.vlgmr.msra.gmra.mrb[0].mxu1 %vm233_vm1, %v464_v15 }
  0xfe   : > { %310 = sbr.rel (!%p535_p5) target bundleno = 269 (0x10d), region = 70 }
 0x100   : > { %v281_v16 = vpop.f32.mrb[0].mxu0  ;;  %v291_v17 = vpop.f32.mrb[0].mxu1 }
 0x101   : > { %298 = vst [vmem:[%s188_s5] sm:$0xff] %v281_v16  ;;  %302 = vst [vmem:[%s188_s5 + $0x20] sm:$0x3] %v291_v17  ;;  %v283_v18 = vpop.f32.mrb[1].mxu0  ;;  %v293_v19 = vpop.f32.mrb[1].mxu1 }
 0x102   : > { %299 = vst [vmem:[%s188_s5 + $0x8] sm:$0xff] %v283_v18  ;;  %303 = vst [vmem:[%s188_s5 + $0x28] sm:$0x3] %v293_v19  ;;  %v285_v20 = vpop.f32.mrb[2].mxu0  ;;  %v295_v21 = vpop.f32.mrb[2].mxu1 }
 0x103   : > { %300 = vst [vmem:[%s188_s5 + $0x10] sm:$0xff] %v285_v20  ;;  %v287_v22 = vpop.f32.mrb[3].mxu0  ;;  %v296_v23 = vpop.f32.mrb[3].mxu1 }
 0x104   : > { %301 = vst [vmem:[%s188_s5 + $0x18] sm:$0xff] %v287_v22 }
 0x108   : > { %v326_v24 = vld [vmem:[%s188_s5] sm:$0xff] }
 0x109   : > { %v328_v25 = vld [vmem:[%s188_s5 + $0x8] sm:$0xff]  ;;  %v334_v28 = vld [vmem:[%s188_s5 + $0x20] sm:$0xff]  ;;  %327 = vst [vmem:[%s313_s9] sm:$0xff] %v326_v24 }
 0x10a   : > { %v330_v26 = vld [vmem:[%s188_s5 + $0x10] sm:$0xff]  ;;  %v336_v29 = vld [vmem:[%s188_s5 + $0x28] sm:$0xff]  ;;  %329 = vst [vmem:[%s313_s9 + $0x8] sm:$0xff] %v328_v25  ;;  %335 = vst [vmem:[%s313_s9 + $0x40] sm:$0xff] %v334_v28 }
 0x10b   : > { %v332_v27 = vld [vmem:[%s188_s5 + $0x18] sm:$0xff]  ;;  %331 = vst [vmem:[%s313_s9 + $0x20] sm:$0xff] %v330_v26  ;;  %337 = vst [vmem:[%s313_s9 + $0x48] sm:$0xff] %v336_v29 }
 0x10c   : > { %333 = vst [vmem:[%s313_s9 + $0x28] sm:$0xff] %v332_v27 }
 0x10d PF: > { %p9_p10 = scmp.ge.s32.totalorder %s522_s13, 4   ;;  %s579_s9 = smov %s483_s10 }
 0x10e   : > { %s580_s10 = smov %s533_s16  ;;  %s581_s11 = smov %s522_s13 }
 0x10f   :  { %11 = sbr.rel (!%p9_p10) target bundleno = 2 (0x2), region = 124 }

// kernel: deform_conv_forward.3
= control target key start
LH: loop header
LB: loop body
LE: loop exit
PB: predicated region body
PF: predicated region fallthrough
CT: control target
= control target key end

     0   :  { %s440_s9 = smov 0   ;;  %s442_s10 = smov 0   ;;  %s495_s0 = inlined_call_operand.vmem [shape: bf16[8,36], index: 0, kind: input, shape index: {}]   ;;  %s496_s1 = inlined_call_operand.vmem [shape: bf16[36,512], index: 1, kind: input, shape index: {}]   ;;  %s497_s2 = inlined_call_operand.vmem [shape: f32[8,512], index: 2, kind: output, shape index: {}]  }
   0x1   :  { %s444_s11 = smov 0  }
   0x2 LB: > { %s345_s12 = sadd.s32 4294967295, %s422_s11   ;;  %s457_s13 = sadd.s32 1, %s422_s11   ;;  %s422_s11 = sphi %s444_s11, %s500_s11   ;;  %s418_s10 = sphi %s442_s10, %s499_s10   ;;  %s414_s9 = sphi %s440_s9, %s498_s9  }
   0x3   : > { %s37_s14 = ssub.s32 %s422_s11, %s457_s13  ;;  %s40_s15 = sadd.s32 1, %s418_s10 }
   0x4   : > { %p38_p0 = scmp.eq.s32.totalorder %s37_s14, 0  ;;  %p47_p1 = scmp.ne.s32.totalorder %s418_s10, %s414_s9 }
   0x5   : > { %p48_p2 = scmp.eq.s32.totalorder %s422_s11, 0  ;;  %p348_p4 = scmp.ge.s32.totalorder %s422_s11, 2 }
   0x6   : > { %s466_s16 = scalar_select %p38_p0, %s418_s10, %s40_s15  }
   0x7   : > { %p49_p3 = por %p48_p2, %p47_p1  ;;  %102 = sbr.rel (%p348_p4) target bundleno = 21 (0x15), region = 20 }
   0xe   : > { %105 = sbr.rel (!%p49_p3) target bundleno = 21 (0x15), region = 24  ;;  %s107_s17 = sand.u32 (%p49_p3), 1, %s418_s10  }
   0xf   : > { %s364_s18 = sshll.u32 (%p49_p3), %s422_s11, 3  ;;  %s365_s19 = smul.u32 (%p49_p3), 40, %s107_s17 }
  0x10   : > { %s112_s22 = scalar_lea.vmem (%p49_p3), %s496_s1, %s364_s18 }
  0x11   : > { %v148_v0 = vld [vmem:[%s112_s22] sm:$0xff] (%p49_p3)  ;;  %v150_v1 = vld [vmem:[%s112_s22 + $0x10] sm:$0xff] (%p49_p3)  ;;  %s109_s23 = scalar_lea.vmem (%p49_p3), [#allocation2], %s365_s19 }
  0x12   : > { %v152_v2 = vld [vmem:[%s112_s22 + $0x20] sm:$0xff] (%p49_p3)  ;;  %v154_v3 = vld [vmem:[%s112_s22 + $0x30] sm:$0xff] (%p49_p3)  ;;  %149 = vst [vmem:[%s109_s23] sm:$0xff] (%p49_p3), %v148_v0  ;;  %151 = vst [vmem:[%s109_s23 + $0x8] sm:$0xff] (%p49_p3), %v150_v1 }
  0x13   : > { %v156_v4 = vld [vmem:[%s112_s22 + $0x40] sm:$0xff] (%p49_p3)  ;;  %153 = vst [vmem:[%s109_s23 + $0x10] sm:$0xff] (%p49_p3), %v152_v2  ;;  %155 = vst [vmem:[%s109_s23 + $0x18] sm:$0xff] (%p49_p3), %v154_v3 }
  0x14   : > { %157 = vst [vmem:[%s109_s23 + $0x20] sm:$0xff] (%p49_p3), %v156_v4 }
  0x15 PF: > { %p351_p5 = scmp.ge.s32.totalorder %s422_s11, 1  ;;  %p162_p6 = scmp.lt.s32.totalorder %s422_s11, 3 }
  0x17   : > { %p163_p7 = pnand %p351_p5, %p162_p6 }
  0x18   : > { %s169_s24 = sand.u32 (!%p163_p7), 1, %s414_s9   ;;  %v424_v5 = vmov (!%p163_p7), 0   ;;  %vm233_vm0 = vcmask (!%p163_p7), 1041408   ;;  %v198_v14 = vld [vmem:[%s495_s0] sm:$0xf] (!%p163_p7)  ;;  %vm229_vm1 = vcmask (!%p163_p7), 293888  }
  0x19   : > { %166 = sbr.rel (%p163_p7) target bundleno = 257 (0x101), region = 62  ;;  %272 = vmatprep.mubr.bf16.mxu0 (!%p163_p7), %v424_v5  ;;  %s352_s29 = sshll.u32 (!%p163_p7), %s345_s12, 1 }
  0x1a   : > { %s366_s25 = smul.u32 (!%p163_p7), 40, %s169_s24  ;;  %p192_p8 = scmp.lt.s32.totalorder (!%p163_p7), %s352_s29, 3 }
  0x1c   : > { %s171_s26 = scalar_lea.vmem (!%p163_p7), [#allocation2], %s366_s25 }
  0x1d   : > { %v392_v6 = vld [vmem:[%s171_s26 + $0x4] ss:$8 sps:$4 sm:$0xff] (!%p163_p7)   ;;  %v394_v7 = vld [vmem:[%s171_s26] ss:$8 sps:$4 sm:$0xff] (!%p163_p7)   ;;  %v395_v8 = vld [vmem:[%s171_s26 + $0x14] ss:$8 sps:$4 sm:$0xff] (!%p163_p7)  }
  0x1e   : > { %240 = vmatprep.subr.bf16.mxu0 (!%p163_p7), %v392_v6  ;;  %v203_v9 = vld [vmem:[%s171_s26 + $0x20] sm:$0x33] (!%p163_p7)  ;;  %v397_v10 = vld [vmem:[%s171_s26 + $0x10] ss:$8 sps:$4 sm:$0xff] (!%p163_p7)  }
  0x1f   : > { %241 = vmatpush1.bf16.msra.mxu0 (!%p163_p7), %v394_v7  ;;  %v359_v11 = vcombine.high (!%p163_p7), %v203_v9, %v203_v9  ;;  %v358_v12 = vcombine.low (!%p163_p7), %v203_v9, %v203_v9 }
  0x20   : > { %242 = vmatprep.subr.bf16.mxu0 %v395_v8  ;;  %s502_s29 = smov (!%p192_p8, %s352_s29), 3 }
  0x21   : > { %v235_v13 = vsel %vm233_vm0, %v358_v12, 0  ;;  %s353_s30 = sshll.u32 %s502_s29, 3 }
  0x22   : > { %s195_s5 = scalar_lea.vmem %s497_s2, %s353_s30 }
  0x23   : > { %243 = vmatpush1.bf16.msra.mxu0 %v397_v10 }
  0x24   : > { %360 = vmatprep.subr.msk.bf16.mxu0 %vm233_vm0, %v359_v11 }
  0x27   : > { %245 = vmatpush1.bf16.msra.mxu0 %v235_v13 }
  0x2a   : > { %361 = vmatmul.mubr.msk.bf16.vlgmr.msra.gmra.mrb[0].mxu0 %vm229_vm1, %v198_v14 }
  0xfd   : > { %v274_v15 = vpop.f32.mrb[0].mxu0 }
  0xfe   : > { %281 = vst [vmem:[%s195_s5] sm:$0xff] %v274_v15  ;;  %v276_v16 = vpop.f32.mrb[1].mxu0 }
  0xff   : > { %282 = vst [vmem:[%s195_s5 + $0x8] sm:$0xff] %v276_v16  ;;  %v278_v17 = vpop.f32.mrb[2].mxu0 }
 0x100   : > { %v279_v18 = vpop.f32.mrb[3].mxu0 }
 0x101 PF: > { %p9_p9 = scmp.ge.s32.totalorder %s457_s13, 4   ;;  %s498_s9 = smov %s418_s10 }
 0x102   : > { %s499_s10 = smov %s466_s16  ;;  %s500_s11 = smov %s457_s13 }
 0x103   :  { %11 = sbr.rel (!%p9_p9) target bundleno = 2 (0x2), region = 101 }

</bundles_post_ra>
